<compile_context>
chip_gen: v7x
topology: tpu7x:2x2x1
jax: 0.10.0
libtpu: 0.0.40
codegen_flags: <defaults>
</compile_context>

<pallas_src>
import jax
import jax.numpy as jnp
from jax.experimental import pallas as pl
from jax.experimental.pallas import tpu as pltpu


# ---------------------------------------------------------------------------
# Pallas kernel: fused  y = x @ w + b + residual   (bf16 MXU feed, f32 acc)
# ---------------------------------------------------------------------------
def _linear_bias_residual_kernel(x_ref, w_ref, b_ref, r_ref, o_ref, acc_ref):
    # x_ref: [tm, tk] bf16   w_ref: [tk, tn] bf16   b_ref: [1, tn] f32
    # r_ref: [tm, tn] native dtype   o_ref: [tm, tn]   acc_ref: [tm, tn] f32
    k = pl.program_id(2)

    @pl.when(k == 0)
    def _():
        # Bias lives in the accumulator from the start: the k==0 step has MXU
        # slack, and this removes a (tm, tn) VPU add from the last-k epilogue.
        acc_ref[...] = jnp.broadcast_to(
            b_ref[...].astype(jnp.float32), acc_ref.shape)

    acc_ref[...] += jnp.dot(x_ref[...], w_ref[...],
                            preferred_element_type=jnp.float32)

    @pl.when(k == pl.num_programs(2) - 1)
    def _():
        # Residual cast + add done once on the f32 accumulator, single store.
        o_ref[...] = (acc_ref[...]
                      + r_ref[...].astype(jnp.float32)).astype(o_ref.dtype)


# ---------------------------------------------------------------------------
# Tiling helpers.
# ---------------------------------------------------------------------------
_VMEM_BUDGET = 20 * 1024 * 1024   # target for the double-buffered working set
_VMEM_LIMIT = 40 * 1024 * 1024    # scoped-VMEM limit handed to Mosaic
                                  # (safe on v5e/v6e 128 MiB and v7x 64 MiB)


def _pad2d(a, row_mult, col_mult):
    r, c = a.shape
    pr, pc = (-r) % row_mult, (-c) % col_mult
    if pr or pc:
        a = jnp.pad(a, ((0, pr), (0, pc)))
    return a


def _pick_tile(dim, candidates):
    for c in candidates:
        if c <= dim and dim % c == 0:
            return c
    return dim  # full extent is always a legal block dim


def _footprint(tm, tn, tk, r_bytes, o_bytes):
    # Double-buffered inputs / output + the single f32 accumulator scratch.
    return (2 * tm * tk * 2           # x   (bf16)
            + 2 * tk * tn * 2         # w   (bf16)
            + 2 * tn * 4              # bias (f32)
            + 2 * tm * tn * r_bytes   # residual (native dtype)
            + 2 * tm * tn * o_bytes   # out
            + tm * tn * 4)            # f32 accumulator


def linear_bias_residual(x2d, w_kn, b_row, r2d):
    """x2d: [M, K], w_kn (pre-padded bf16): [Kp, Np], b_row (pre-padded f32):
    [1, Np], r2d: [M, N] (native dtype)  ->  [M, N] in x2d.dtype."""
    M, K = x2d.shape
    N = r2d.shape[1]
    Kp, Np = w_kn.shape
    out_dtype = x2d.dtype

    # Per-call padding only for x / residual (weight & bias were padded once at
    # module init).  No-ops when the shapes are already (8, 128)-aligned.
    x_p = _pad2d(x2d.astype(jnp.bfloat16), 8, 128)   # bf16 MXU feed
    r_p = _pad2d(r2d, 8, 128)                        # native dtype, cast in-kernel
    Mp = x_p.shape[0]
    assert x_p.shape[1] == Kp and r_p.shape[1] == Np

    r_bytes = jnp.dtype(r_p.dtype).itemsize
    o_bytes = jnp.dtype(out_dtype).itemsize

    tm = _pick_tile(Mp, (512, 256, 128, 64, 32, 16, 8))
    tn = _pick_tile(Np, (1024, 512, 256, 128))
    tk = _pick_tile(Kp, (2048, 1024, 512, 256, 128))

    # Keep the double-buffered working set within a budget that fits every
    # generation (v7x has only 64 MiB physical VMEM per TensorCore).
    while _footprint(tm, tn, tk, r_bytes, o_bytes) > _VMEM_BUDGET and tk > 128:
        tk //= 2
    while _footprint(tm, tn, tk, r_bytes, o_bytes) > _VMEM_BUDGET and tn > 128:
        tn //= 2
    while _footprint(tm, tn, tk, r_bytes, o_bytes) > _VMEM_BUDGET and tm > 8:
        tm //= 2

    # v7x has 2 TensorCores per chip: expose at least 2 output blocks on the
    # "parallel" (i, j) axes so the second core is not idle on small calls.
    while (Mp // tm) * (Np // tn) < 2:
        if tm >= 16:
            tm //= 2
        elif tn >= 256:
            tn //= 2
        else:
            break

    grid = (Mp // tm, Np // tn, Kp // tk)

    cost = pl.CostEstimate(
        flops=2 * Mp * Np * Kp + 2 * Mp * Np,
        transcendentals=0,
        bytes_accessed=(2 * Mp * Kp            # x  (bf16)
                        + 2 * Kp * Np          # w  (bf16)
                        + 4 * Np               # bias (f32)
                        + r_bytes * Mp * Np    # residual
                        + o_bytes * Mp * Np),  # out
    )

    out = pl.pallas_call(
        _linear_bias_residual_kernel,
        out_shape=jax.ShapeDtypeStruct((Mp, Np), out_dtype),
        grid=grid,
        in_specs=[
            pl.BlockSpec((tm, tk), lambda i, j, k: (i, k)),   # x   (bf16)
            pl.BlockSpec((tk, tn), lambda i, j, k: (k, j)),   # w   (bf16, pre-T)
            pl.BlockSpec((1, tn), lambda i, j, k: (0, j)),    # bias (f32)
            pl.BlockSpec((tm, tn), lambda i, j, k: (i, j)),   # residual
        ],
        out_specs=pl.BlockSpec((tm, tn), lambda i, j, k: (i, j)),
        scratch_shapes=[pltpu.VMEM((tm, tn), jnp.float32)],
        # NOTE: no input_output_aliases on the residual -- the wrapper's
        # semantics do not invalidate the caller's kwargs, and without real
        # donation XLA would insert a defensive copy anyway.
        compiler_params=pltpu.CompilerParams(
            dimension_semantics=("parallel", "parallel", "arbitrary"),
            vmem_limit_bytes=_VMEM_LIMIT),
        cost_estimate=cost,
    )(x_p, w_kn, b_row, r_p)

    if (Mp, Np) != (M, N):
        out = out[:M, :N]
    return out


# ---------------------------------------------------------------------------
# The wrapped module (stand-in for the arbitrary `module` the PyTorch wrapper
# receives): Linear(hidden -> out) with bias, plus a kwarg residual.
# ---------------------------------------------------------------------------
class InnerLinearModule:
    def __init__(self, hidden, out, dtype=jnp.float32):
        kw, kb = jax.random.split(jax.random.PRNGKey(42))
        # PyTorch nn.Linear convention: weight is [out, in].
        self.weight = jax.random.normal(kw, (out, hidden), dtype) * 0.05
        self.bias = jax.random.normal(kb, (out,), dtype) * 0.05
        # One-time prep (no per-call HBM passes):
        #   * transpose to [H, O], pad K / N to multiples of 128
        #   * cast the weight to bf16 so the MXU runs its native bf16 path
        #   * bias stays f32 (added once into the f32 accumulator)
        w_t = _pad2d(jnp.transpose(self.weight), 128, 128)   # [Kp, Np]
        self.weight_t = w_t.astype(jnp.bfloat16)
        self.bias_row = _pad2d(self.bias.reshape(1, out), 1, 128)  # [1, Np] f32
        self.out_features = out
        self.training = False

    def __call__(self, x, *, residual):
        # x: [B, S, H], residual: [B, S, O] -> [B, S, O]
        B, S, H = x.shape
        O = self.out_features
        x2d = x.reshape(B * S, H)              # glue: reshape only
        r2d = residual.reshape(B * S, O)       # glue: reshape only
        y2d = linear_bias_residual(x2d, self.weight_t, self.bias_row, r2d)
        return y2d.reshape(B, S, O)


# ---------------------------------------------------------------------------
# Flat-tensor (de)serialization helpers (sfast's convert_*_flat_tensors).
# Pure Python pytree glue, no tensor compute -- not a kernel.
# ---------------------------------------------------------------------------
def convert_to_flat_tensors(outputs):
    leaves, treedef = jax.tree_util.tree_flatten(outputs)
    return tuple(leaves), treedef


def convert_from_flat_tensors(flat_args, treedef):
    return jax.tree_util.tree_unflatten(treedef, list(flat_args))


# ---------------------------------------------------------------------------
# The wrapper itself: positional-only flat-tensor interface.
# ---------------------------------------------------------------------------
class TraceablePosArgOnlyModuleWrapper:
    def __init__(self, module, args_kwargs_treedef):
        self.module = module
        self.training = getattr(module, "training", False)
        self._treedef = args_kwargs_treedef

    def __call__(self, *args):
        orig_args, orig_kwargs = convert_from_flat_tensors(args, self._treedef)
        outputs = self.module(*orig_args, **orig_kwargs)
        flat_outputs, _ = convert_to_flat_tensors(outputs)
        return flat_outputs


# ---------------------------------------------------------------------------
# Demo / correctness check.
# ---------------------------------------------------------------------------
if __name__ == "__main__":
    # Small, lane-aligned demo shapes.  M = B*S = 128, K = N = 256:
    # tile selection gives tm=64 (halved so both v7x TCs get a block),
    # tn=256, tk=256 -> grid (2, 1, 1).
    B, S, H, O = 2, 64, 256, 256

    key = jax.random.PRNGKey(0)
    kx, kr = jax.random.split(key)
    x = jax.random.normal(kx, (B, S, H), jnp.float32)
    residual = jax.random.normal(kr, (B, S, O), jnp.float32)

    inner = InnerLinearModule(H, O)

    # Reference in plain JAX (f32).
    y_ref = jnp.einsum("bsh,oh->bso", x, inner.weight) + inner.bias + residual
    y_ref = jax.block_until_ready(y_ref)

    # Build the (args, kwargs) structure once and capture its treedef --
    # exactly the structure the PyTorch wrapper reconstructs from flat args.
    structure = ((x,), {"residual": residual})
    flat_args, treedef = convert_to_flat_tensors(structure)

    wrapper = TraceablePosArgOnlyModuleWrapper(inner, treedef)

    flat_outputs = wrapper(*flat_args)
    flat_outputs = jax.block_until_ready(flat_outputs)

    y = flat_outputs[0]
    assert y.shape == (B, S, O) and y.dtype == jnp.float32
    # Tolerance reflects the deliberate bf16 MXU feed (f32 accumulation):
    # expected abs error is a few 1e-3 at these magnitudes.
    assert jnp.allclose(y, y_ref, atol=5e-2, rtol=5e-2)

    print("KERNEL_OK")
</pallas_src>

<mosaic_0001>
module attributes {stable_mosaic.version = 11 : i64} {
  func.func @_linear_bias_residual_kernel(%arg0: i32, %arg1: i32, %arg2: i32, %arg3: memref<64x256xbf16, #tpu.memory_space<vmem>>, %arg4: memref<256x256xbf16, #tpu.memory_space<vmem>>, %arg5: memref<1x256xf32, #tpu.memory_space<vmem>>, %arg6: memref<64x256xf32, #tpu.memory_space<vmem>>, %arg7: memref<64x256xf32, #tpu.memory_space<vmem>>, %arg8: memref<64x256xf32, #tpu.memory_space<vmem>>) attributes {dimension_semantics = [#tpu.dimension_semantics<parallel>, #tpu.dimension_semantics<parallel>, #tpu.dimension_semantics<arbitrary>], iteration_bounds = array<i64: 2, 1, 1>, scalar_prefetch = 0 : i64, scratch_operands = 1 : i64, tpu.core_type = #tpu.core_type<tc>, window_params = [{transform_indices = @transform_0, window_bounds = array<i64: 64, 256>}, {transform_indices = @transform_1, window_bounds = array<i64: 256, 256>}, {transform_indices = @transform_2, window_bounds = array<i64: 1, 256>}, {transform_indices = @transform_3, window_bounds = array<i64: 64, 256>}, {transform_indices = @transform_4, window_bounds = array<i64: 64, 256>}]} {
    %c0_i32 = arith.constant 0 : i32
    %0 = arith.cmpi eq, %arg2, %c0_i32 : i32
    %1 = arith.extui %0 : i1 to i32
    %c0_i32_0 = arith.constant 0 : i32
    %2 = arith.cmpi ne, %1, %c0_i32_0 : i32
    scf.if %2 {
      %c0_10 = arith.constant 0 : index
      %c0_11 = arith.constant 0 : index
      %12 = vector.load %arg5[%c0_10, %c0_11] : memref<1x256xf32, #tpu.memory_space<vmem>>, vector<1x256xf32>
      %13 = vector.shape_cast %12 : vector<1x256xf32> to vector<1x256xf32>
      %14 = vector.broadcast %13 : vector<1x256xf32> to vector<64x256xf32>
      %c0_12 = arith.constant 0 : index
      %c0_13 = arith.constant 0 : index
      %15 = vector.load %arg8[%c0_12, %c0_13] : memref<64x256xf32, #tpu.memory_space<vmem>>, vector<64x256xf32>
      tpu.vector_store %arg8[%c0_12, %c0_13], %14 {strides = array<i32>} : memref<64x256xf32, #tpu.memory_space<vmem>>, vector<64x256xf32>,
    } else {
    }
    %c0 = arith.constant 0 : index
    %c0_1 = arith.constant 0 : index
    %3 = vector.load %arg8[%c0, %c0_1] : memref<64x256xf32, #tpu.memory_space<vmem>>, vector<64x256xf32>
    %c0_2 = arith.constant 0 : index
    %c0_3 = arith.constant 0 : index
    %4 = vector.load %arg3[%c0_2, %c0_3] : memref<64x256xbf16, #tpu.memory_space<vmem>>, vector<64x256xbf16>
    %c0_4 = arith.constant 0 : index
    %c0_5 = arith.constant 0 : index
    %5 = vector.load %arg4[%c0_4, %c0_5] : memref<256x256xbf16, #tpu.memory_space<vmem>>, vector<256x256xbf16>
    %cst = arith.constant dense<0.000000e+00> : vector<64x256xf32>
    %6 = tpu.matmul %4, %5, %cst {dimension_numbers = #tpu.dot_dimension_numbers<[1], [0], [0], [1], [0, 0, 1, 1], [], []>} : vector<64x256xbf16>, vector<256x256xbf16>, vector<64x256xf32> -> vector<64x256xf32>
    %7 = arith.addf %3, %6 : vector<64x256xf32>
    %c0_6 = arith.constant 0 : index
    %c0_7 = arith.constant 0 : index
    %8 = vector.load %arg8[%c0_6, %c0_7] : memref<64x256xf32, #tpu.memory_space<vmem>>, vector<64x256xf32>
    tpu.vector_store %arg8[%c0_6, %c0_7], %7 {strides = array<i32>} : memref<64x256xf32, #tpu.memory_space<vmem>>, vector<64x256xf32>,
    %c0_i32_8 = arith.constant 0 : i32
    %9 = arith.cmpi eq, %arg2, %c0_i32_8 : i32
    %10 = arith.extui %9 : i1 to i32
    %c0_i32_9 = arith.constant 0 : i32
    %11 = arith.cmpi ne, %10, %c0_i32_9 : i32
    scf.if %11 {
      %c0_10 = arith.constant 0 : index
      %c0_11 = arith.constant 0 : index
      %12 = vector.load %arg8[%c0_10, %c0_11] : memref<64x256xf32, #tpu.memory_space<vmem>>, vector<64x256xf32>
      %c0_12 = arith.constant 0 : index
      %c0_13 = arith.constant 0 : index
      %13 = vector.load %arg6[%c0_12, %c0_13] : memref<64x256xf32, #tpu.memory_space<vmem>>, vector<64x256xf32>
      %14 = arith.addf %12, %13 : vector<64x256xf32>
      %c0_14 = arith.constant 0 : index
      %c0_15 = arith.constant 0 : index
      %15 = vector.load %arg7[%c0_14, %c0_15] : memref<64x256xf32, #tpu.memory_space<vmem>>, vector<64x256xf32>
      tpu.vector_store %arg7[%c0_14, %c0_15], %14 {strides = array<i32>} : memref<64x256xf32, #tpu.memory_space<vmem>>, vector<64x256xf32>,
    } else {
    }
    return
  }
  func.func @transform_0(%arg0: i32, %arg1: i32, %arg2: i32) -> (i32, i32) {
    %c0_i32 = arith.constant 0 : i32
    return %arg0, %arg2 : i32, i32
  }
  func.func @transform_1(%arg0: i32, %arg1: i32, %arg2: i32) -> (i32, i32) {
    %c0_i32 = arith.constant 0 : i32
    return %arg2, %arg1 : i32, i32
  }
  func.func @transform_2(%arg0: i32, %arg1: i32, %arg2: i32) -> (i32, i32) {
    %c0_i32 = arith.constant 0 : i32
    %c0_i32_0 = arith.constant 0 : i32
    return %c0_i32, %arg1 : i32, i32
  }
  func.func @transform_3(%arg0: i32, %arg1: i32, %arg2: i32) -> (i32, i32) {
    %c0_i32 = arith.constant 0 : i32
    return %arg0, %arg1 : i32, i32
  }
  func.func @transform_4(%arg0: i32, %arg1: i32, %arg2: i32) -> (i32, i32) {
    %c0_i32 = arith.constant 0 : i32
    return %arg0, %arg1 : i32, i32
  }
}

</mosaic_0001>

<bundles_post_ra>
// kernel: tpu_custom_call.1
= control target key start
LH: loop header
LB: loop body
LE: loop exit
PB: predicated region body
PF: predicated region fallthrough
CT: control target
= control target key end

     0   :  { %s1765_s0 = inlined_call_operand.hbm [shape: bf16[128,256], index: 0, kind: input, shape index: {}]   ;;  %s1766_s1 = inlined_call_operand.hbm [shape: bf16[256,256], index: 1, kind: input, shape index: {}]   ;;  %s1767_s2 = inlined_call_operand.vmem [shape: f32[1,256], index: 2, kind: input, shape index: {}]   ;;  %s1768_s3 = inlined_call_operand.hbm [shape: f32[128,256], index: 3, kind: input, shape index: {}]   ;;  %s1769_s4 = inlined_call_operand.hbm [shape: f32[128,256], index: 4, kind: output, shape index: {}]  }
   0x1   :  { %1777 = sst [smem:[#allocation15_spill]] %s1765_s0 }
   0x2   :  { %1778 = sst [smem:[#allocation16_spill]] %s1768_s3 }
   0x3   :  { %9 = vsyncpa [#allocation4], 0 }
   0x4   :  { %11 = vsyncpa [#allocation4 + $0x1], 0 }
   0x5   :  { %12 = vsyncpa [#allocation7], 0 }
   0x6   :  { %13 = vsyncpa [#allocation5], 0 }
   0x7   :  { %15 = vsyncpa [#allocation5 + $0x1], 0  ;;  %s1418_s15 = smov 0   ;;  %s1420_s16 = smov 0  }
   0x8   :  { %s1422_s17 = smov 0   ;;  %s1424_s18 = smov 0  }
   0x9   :  { %s1426_s19 = smov 0   ;;  %s1428_s20 = smov 0  }
   0xa LB: > { %s40_s21 = sadd.s32 1, %s1377_s19  ;;  %s49_s22 = sadd.s32 1, %s1369_s17  ;;  %s1381_s20 = sphi %s1428_s20, %s21_s20   ;;  %s1377_s19 = sphi %s1426_s19, %s1803_s19   ;;  %s1373_s18 = sphi %s1424_s18, %s1802_s18   ;;  %s1369_s17 = sphi %s1422_s17, %s1801_s17   ;;  %s1365_s16 = sphi %s1420_s16, %s1800_s16   ;;  %s1361_s15 = sphi %s1418_s15, %s1799_s15  }
   0xb   : > { %p42_p0 = scmp.ge.s32.totalorder %s40_s21, 2  ;;  %p56_p1 = scmp.ne.s32.totalorder %s1369_s17, %s1365_s16 }
   0xc   : > { %p57_p2 = scmp.eq.s32.totalorder %s1381_s20, 0  ;;  %p1085_p6 = scmp.lt.s32.totalorder %s1381_s20, 2 }
   0xd   : > { %s1805_s21 = smov (%p42_p0, %s40_s21), 0  ;;  %s223_s25 = sand.u32 1, %s1381_s20  }
   0xe   : > { %1779 = sst [smem:[#allocation14_spill]] %s1805_s21  ;;  %p1458_p3 = por %p57_p2, %p56_p1 }
   0xf   : > { %s44_s24 = ssub.s32 %s1377_s19, %s1805_s21  ;;  %s225_s26 = sand.u32 1, %s1369_s17  }
  0x10   : > { %p47_p5 = scmp.eq.s32.totalorder %s44_s24, 0  ;;  %s962_s28 = sshll.u32 %s225_s26, 6 }
  0x11   : > { %s1022_s29 = sshll.u32 %s1377_s19, 10  ;;  %s1781_s0 = sld [smem:[#allocation15_spill]] }
  0x12   : > { %s1469_s27 = scalar_select %p47_p5, %s1369_s17, %s49_s22  }
  0x13   : > { %s227_s7 = scalar_lea.vmem [#allocation3], %s962_s28  ;;  %p1481_p7 = pnand %p1085_p6, %p1458_p3 }
  0x14   : > { %s237_s8 = sshll.u32 %s227_s7, 4  ;;  %s1485_s10 = sshll.u32 %s225_s26, 7  ;;  %s1477_s8 = int_to_ptr.vmem [resolvable:$true] %s237_s8 }
  0x15   : > { %s1487_s11 = scalar_lea.sflag [#allocation4], %s223_s25  ;;  %p1205_p9 = pneg %p1481_p7 }
  0x17   : > { %s1475_s6 = scalar_lea.hbm %s1781_s0, %s1022_s29  ;;  %s1208_s22 = scalar_lea.hbm %s1781_s0, 2048 }
  0x18   : > { %s1203_s12 = scalar_lea.hbm %s1475_s6, 1024  ;;  %p1209_p12 = scmp.lt.u32.totalorder %s1475_s6, %s1781_s0 }
  0x19   : > { %p1204_p8 = scmp.ne.s32.totalorder %s1475_s6, %s1203_s12  ;;  %p1210_p13 = scmp.lt.u32.totalorder %s1208_s22, %s1203_s12 }
  0x1a   : > { %p1212_p2 = scmp.lt.u32.totalorder %s1203_s12, %s1475_s6 }
  0x1b   : > { %p1206_p10 = pnand %p1205_p9, %p1204_p8  ;;  %p1211_p0 = por %p1210_p13, %p1209_p12 }
  0x1d   : > { %p1207_p11 = pneg %p1206_p10  ;;  %p1213_p3 = por %p1212_p2, %p1211_p0 }
  0x1f   : > { %p1214_p5 = pnand %p1213_p3, %p1207_p11 }
  0x21   : > { %1217 = shalt.err (!%p1214_p5)
}
  0x22   : > { %s1218_s25 = scalar_lea.vmem %s1477_s8, 1024  ;;  %s1383_s26 = smov [#allocation3]  }
  0x23   : > { %p1219_p6 = scmp.ne.s32.totalorder %s1477_s8, %s1218_s25  ;;  %s1223_s28 = sshll.u32 %s1383_s26, 4  ;;  %s1224_s28 = int_to_ptr.vmem [resolvable:$false] %s1223_s28 }
  0x24   : > { %s1225_s29 = scalar_lea.vmem %s1224_s28, 2048  ;;  %p1226_p4 = scmp.lt.s32.totalorder %s1477_s8, %s1224_s28 }
  0x25   : > { %p1221_p8 = pnand %p1219_p6, %p1205_p9  ;;  %p1227_p12 = scmp.lt.s32.totalorder %s1225_s29, %s1218_s25 }
  0x27   : > { %p1222_p10 = pneg %p1221_p8  ;;  %p1228_p13 = por %p1227_p12, %p1226_p4 }
  0x29   : > { %p1229_p0 = pnand %p1228_p13, %p1222_p10 }
  0x2b   : > { %1232 = shalt.err (!%p1229_p0)
}
  0x2c   : > { %s1770_s30 = smov 128   ;;  %s1773_s5 = smov 8  }
  0x2d   : > { %1076 = dma.hbm_to_vmem [thread:$0]  (!%p1481_p7), %s1475_s6, 1024, %s1477_s8, %s1487_s11, %s1770_s30, %s1770_s30, %s1773_s5  }
  0x2e   : > { %s251_s7 = scalar_lea.vmem [#allocation8], %s1485_s10  ;;  %s1520_s13 = sadd.s32 4294967295, %s1381_s20  }
  0x2f   : > { %s261_s12 = sshll.u32 %s251_s7, 4  ;;  %s957_s14 = sadd.s32 4294967294, %s1381_s20   ;;  %s1558_s12 = int_to_ptr.vmem [resolvable:$true] %s261_s12 }
  0x30   : > { %p62_p4 = scmp.ne.s32.totalorder %s1365_s16, %s1361_s15  ;;  %p1771_p11 = scmp.eq.s32.totalorder %s1520_s13, 0 }
  0x31   : > { %p170_p2 = scmp.eq.s32.totalorder %s1520_s13, 1  ;;  %p176_p3 = scmp.eq.s32.totalorder %s957_s14, 1 }
  0x32   : > { %p1529_p5 = por %p1771_p11, %p62_p4  ;;  %p958_p6 = scmp.ge.s32.totalorder %s1381_s20, 1 }
  0x33   : > { %p1537_p8 = por %p170_p2, %p56_p1  ;;  %p1541_p10 = por %p176_p3, %p62_p4 }
  0x34   : > { %s1783_s22 = scalar_select %p1529_p5, 1, 0 }
  0x35   : > { %s1784_s6 = scalar_select %p1537_p8, 1, 0 }
  0x36   : > { %s1785_s8 = scalar_select %p1541_p10, 1, 0 }
  0x37   : > { %p183_p12 = scmp.lt.s32.totalorder %s1381_s20, 3  ;;  %s1024_s10 = sshll.u32 %s1377_s19, 11 }
  0x38   : > { %s1386_s24 = smov [#allocation6]   ;;  %s1787_s3 = sld [smem:[#allocation16_spill]] }
  0x39   : > { %p1547_p13 = pnand %p958_p6, %p183_p12  ;;  %s201_s25 = sshll.u32 %s1386_s24, 4  ;;  %s1560_s25 = int_to_ptr.vmem [resolvable:$true] %s201_s25 }
  0x3b   : > { %s1786_s23 = scalar_select %p1547_p13, 1, 0 }
  0x3c   : > { %p1069_p1 = pneg %p1547_p13 }
  0x3e   : > { %s1554_s29 = scalar_lea.hbm %s1787_s3, %s1024_s10  ;;  %p1564_p0 = pnand %p1069_p1, %p1771_p11 }
  0x3f   : > { %s1233_s14 = scalar_lea.hbm %s1554_s29, 2048  ;;  %s1238_s26 = scalar_lea.hbm %s1787_s3, 4096 }
  0x40   : > { %p1234_p4 = scmp.ne.s32.totalorder %s1554_s29, %s1233_s14  ;;  %p1239_p6 = scmp.lt.u32.totalorder %s1554_s29, %s1787_s3 }
  0x41   : > { %p1240_p12 = scmp.lt.u32.totalorder %s1238_s26, %s1233_s14  ;;  %p1242_p1 = scmp.lt.u32.totalorder %s1233_s14, %s1554_s29 }
  0x42   : > { %p1236_p2 = pnand %p1234_p4, %p1205_p9 }
  0x43   : > { %p1241_p10 = por %p1240_p12, %p1239_p6 }
  0x44   : > { %p1237_p3 = pneg %p1236_p2 }
  0x45   : > { %p1243_p11 = por %p1242_p1, %p1241_p10 }
  0x47   : > { %p1244_p8 = pnand %p1243_p11, %p1237_p3 }
  0x49   : > { %1247 = shalt.err (!%p1244_p8)
}
  0x4a   : > { %s1248_s5 = scalar_lea.vmem %s1558_s12, 2048  ;;  %s1387_s10 = smov [#allocation8]  }
  0x4b   : > { %p1249_p4 = scmp.ne.s32.totalorder %s1558_s12, %s1248_s5  ;;  %s1253_s24 = sshll.u32 %s1387_s10, 4  ;;  %s1254_s24 = int_to_ptr.vmem [resolvable:$false] %s1253_s24 }
  0x4c   : > { %s1255_s30 = scalar_lea.vmem %s1254_s24, 4096  ;;  %p1256_p13 = scmp.lt.s32.totalorder %s1558_s12, %s1254_s24 }
  0x4d   : > { %p1251_p2 = pnand %p1249_p4, %p1205_p9  ;;  %p1257_p6 = scmp.lt.s32.totalorder %s1255_s30, %s1248_s5 }
  0x4f   : > { %p1252_p5 = pneg %p1251_p2  ;;  %p1258_p12 = por %p1257_p6, %p1256_p13 }
  0x51   : > { %p1259_p10 = pnand %p1258_p12, %p1252_p5 }
  0x53   : > { %1262 = shalt.err (!%p1259_p10)
}
  0x54   : > { %s1388_s14 = smov 256   ;;  %s1389_s26 = smov 16  }
  0x55   : > { %1079 = dma.hbm_to_vmem [thread:$0]  (!%p1481_p7), %s1554_s29, 2048, %s1558_s12, %s1487_s11, %s1388_s14, %s1388_s14, %s1389_s26  }
  0x56   : > { %s1263_s10 = scalar_lea.hbm %s1766_s1, 4096  ;;  %p1265_p11 = pneg %p1564_p0 }
  0x57   : > { %p1264_p9 = scmp.ne.s32.totalorder %s1766_s1, %s1263_s10  ;;  %p1270_p13 = scmp.lt.u32.totalorder %s1263_s10, %s1766_s1 }
  0x59   : > { %p1266_p5 = pnand %p1265_p11, %p1264_p9 }
  0x5b   : > { %p1267_p8 = pneg %p1266_p5 }
  0x5d   : > { %p1272_p3 = pnand %p1270_p13, %p1267_p8 }
  0x5f   : > { %1275 = shalt.err (!%p1272_p3)
}
  0x60   : > { %s1276_s9 = scalar_lea.vmem %s1560_s25, 4096  ;;  %p1284_p2 = scmp.lt.s32.totalorder %s1560_s25, %s1560_s25 }
  0x61   : > { %p1277_p7 = scmp.ne.s32.totalorder %s1560_s25, %s1276_s9  ;;  %p1285_p6 = scmp.lt.s32.totalorder %s1276_s9, %s1276_s9 }
  0x63   : > { %p1279_p1 = pnand %p1277_p7, %p1265_p11  ;;  %p1286_p12 = por %p1285_p6, %p1284_p2 }
  0x65   : > { %p1280_p4 = pneg %p1279_p1 }
  0x67   : > { %p1287_p10 = pnand %p1286_p12, %p1280_p4 }
  0x69   : > { %1290 = shalt.err (!%p1287_p10)
}
  0x6a   : > { %s1789_s0 = smov 8   ;;  %s1790_s3 = smov 128  }
  0x6b   : > { %1072 = dma.hbm_to_vmem [thread:$0]  (!%p1564_p0), %s1766_s1, 4096, %s1560_s25, [#allocation7], %s1790_s3, %s1790_s3, %s1789_s0  }
  0x6c   : > { %p1791_p9 = scmp.ne.s32.totalorder %s1786_s23, 0 }
  0x6d   : > { %s275_s12 = sand.u32 (!%p1791_p9), 1, %s1520_s13   ;;  %s1620_s29 = sand.u32 (!%p1791_p9), 1, %s1365_s16  }
  0x6e   : > { %273 = sbr.rel (%p1791_p9) target bundleno = 431 (0x1af), region = 36  ;;  %s971_s30 = sshll.u32 (!%p1791_p9), %s1620_s29, 6 }
  0x6f   : > { %s276_s7 = scalar_lea.sflag (!%p1791_p9), [#allocation4], %s275_s12  ;;  %s1623_s14 = scalar_lea.vmem (!%p1791_p9), [#allocation3], %s971_s30 }
  0x70   : > { %p1792_p11 = scmp.ne.s32.totalorder (!%p1791_p9), %s1783_s22, 0 }
  0x75   : > { %1344 = dma.done.wait (%p1792_p11), %s276_s7, 1024  }
  0x76   : > { %1346 = vsyncadd (%p1792_p11), %s276_s7, 4294966272  ;;  %p1793_p0 = scmp.eq.s32.totalorder %s1520_s13, 0 }
  0x78   : > { %1348 = dma.done.wait (%p1793_p0), [#allocation7], 4096   ;;  %p1794_p5 = pmov %p1793_p0 }
  0x79   : > { %s973_s23 = sshll.u32 %s1620_s29, 7 }
  0x7a   : > { %1350 = vsyncadd (%p1794_p5), [#allocation7], 4294963200  ;;  %s1636_s25 = scalar_lea.vmem [#allocation8], %s973_s23 }
  0x7b   : > { %1352 = dma.done.wait (%p1792_p11), %s276_s7, 2048  }
  0x7c   : > { %1354 = vsyncadd (%p1792_p11), %s276_s7, 4294965248  ;;  %v1143_v0 = vld [vmem:[#allocation6 + $0x4] ss:$8 sps:$4 sm:$0xff]   ;;  %v1145_v1 = vld [vmem:[#allocation6] ss:$8 sps:$4 sm:$0xff]   ;;  %v345_v40 = vlaneseq  ;;  %s1675_s26 = scalar_lea.vmem [#allocation9], %s973_s23 }
  0x7d   : > { %627 = vmatprep.subr.bf16.mxu0 %v1143_v0  ;;  %1027 = vmatprep.subr.bf16.mxu1 %v1143_v0  ;;  %v1146_v2 = vld [vmem:[#allocation6 + $0x14] ss:$8 sps:$4 sm:$0xff]   ;;  %v1148_v3 = vld [vmem:[#allocation6 + $0x10] ss:$8 sps:$4 sm:$0xff]   ;;  %v1149_v4 = vld [vmem:[#allocation6 + $0x24] ss:$8 sps:$4 sm:$0xff]  }
  0x7e   : > { %628 = vmatpush1.bf16.msra.mxu0 %v1145_v1  ;;  %1043 = vmatpush1.bf16.msra.mxu1 %v1145_v1  ;;  %v1151_v5 = vld [vmem:[#allocation6 + $0x20] ss:$8 sps:$4 sm:$0xff]   ;;  %v1152_v6 = vld [vmem:[#allocation6 + $0x34] ss:$8 sps:$4 sm:$0xff]   ;;  %v1154_v7 = vld [vmem:[#allocation6 + $0x30] ss:$8 sps:$4 sm:$0xff]  }
  0x7f   : > { %629 = vmatprep.subr.bf16.mxu0 %v1146_v2  ;;  %1028 = vmatprep.subr.bf16.mxu1 %v1146_v2  ;;  %v1155_v8 = vld [vmem:[#allocation6 + $0x44] ss:$8 sps:$4 sm:$0xff]   ;;  %v1157_v9 = vld [vmem:[#allocation6 + $0x40] ss:$8 sps:$4 sm:$0xff]   ;;  %v1158_v10 = vld [vmem:[#allocation6 + $0x54] ss:$8 sps:$4 sm:$0xff]  }
  0x80   : > { %v1160_v11 = vld [vmem:[#allocation6 + $0x50] ss:$8 sps:$4 sm:$0xff]   ;;  %v1161_v12 = vld [vmem:[#allocation6 + $0x64] ss:$8 sps:$4 sm:$0xff]   ;;  %v1163_v14 = vld [vmem:[#allocation6 + $0x60] ss:$8 sps:$4 sm:$0xff]  }
  0x81   : > { %v1193_v13 = vld [vmem:[%s1623_s14 + $0x4] ss:$8 sps:$4 sm:$0xff]   ;;  %v1164_v16 = vld [vmem:[#allocation6 + $0x74] ss:$8 sps:$4 sm:$0xff]   ;;  %v1166_v17 = vld [vmem:[#allocation6 + $0x70] ss:$8 sps:$4 sm:$0xff]  }
  0x82   : > { %630 = vmatpush1.bf16.msra.mxu0 %v1148_v3  ;;  %1044 = vmatpush1.bf16.msra.mxu1 %v1148_v3  ;;  %v1196_v15 = vld [vmem:[%s1623_s14 + $0x24] ss:$8 sps:$4 sm:$0xff]   ;;  %v1169_v19 = vld [vmem:[#allocation6 + $0x80] ss:$8 sps:$4 sm:$0xff]   ;;  %v1170_v20 = vld [vmem:[#allocation6 + $0x94] ss:$8 sps:$4 sm:$0xff]  }
  0x83   : > { %631 = vmatprep.subr.bf16.mxu0 %v1149_v4  ;;  %1029 = vmatprep.subr.bf16.mxu1 %v1149_v4  ;;  %v1167_v18 = vld [vmem:[#allocation6 + $0x84] ss:$8 sps:$4 sm:$0xff]   ;;  %v1172_v21 = vld [vmem:[#allocation6 + $0x90] ss:$8 sps:$4 sm:$0xff]   ;;  %v1175_v23 = vld [vmem:[#allocation6 + $0xa0] ss:$8 sps:$4 sm:$0xff]  }
  0x84   : > { %659 = vmatprep.mubr.bf16.mxu0 %v1193_v13  ;;  %679 = vmatprep.mubr.bf16.mxu1 %v1196_v15  ;;  %v1173_v22 = vld [vmem:[#allocation6 + $0xa4] ss:$8 sps:$4 sm:$0xff]   ;;  %v1176_v24 = vld [vmem:[#allocation6 + $0xb4] ss:$8 sps:$4 sm:$0xff]   ;;  %v1178_v25 = vld [vmem:[#allocation6 + $0xb0] ss:$8 sps:$4 sm:$0xff]  }
  0x85   : > { %v1179_v26 = vld [vmem:[#allocation6 + $0xc4] ss:$8 sps:$4 sm:$0xff]   ;;  %v1181_v27 = vld [vmem:[#allocation6 + $0xc0] ss:$8 sps:$4 sm:$0xff]   ;;  %v1182_v28 = vld [vmem:[#allocation6 + $0xd4] ss:$8 sps:$4 sm:$0xff]  }
  0x86   : > { %632 = vmatpush1.bf16.msra.mxu0 %v1151_v5  ;;  %1045 = vmatpush1.bf16.msra.mxu1 %v1151_v5  ;;  %v1184_v29 = vld [vmem:[#allocation6 + $0xd0] ss:$8 sps:$4 sm:$0xff]   ;;  %v1185_v30 = vld [vmem:[#allocation6 + $0xe4] ss:$8 sps:$4 sm:$0xff]   ;;  %v1187_v31 = vld [vmem:[#allocation6 + $0xe0] ss:$8 sps:$4 sm:$0xff]  }
  0x87   : > { %633 = vmatprep.subr.bf16.mxu0 %v1152_v6  ;;  %1030 = vmatprep.subr.bf16.mxu1 %v1152_v6  ;;  %v1188_v32 = vld [vmem:[#allocation6 + $0xf4] ss:$8 sps:$4 sm:$0xff]   ;;  %v1190_v33 = vld [vmem:[#allocation6 + $0xf0] ss:$8 sps:$4 sm:$0xff]   ;;  %v1191_v34 = vld [vmem:[%s1623_s14] ss:$8 sps:$4 sm:$0xff]  }
  0x88   : > { %v1194_v35 = vld [vmem:[%s1623_s14 + $0x20] ss:$8 sps:$4 sm:$0xff]   ;;  %v1197_v36 = vld [vmem:[%s1623_s14 + $0x14] ss:$8 sps:$4 sm:$0xff]   ;;  %v1201_v38 = vld [vmem:[%s1623_s14 + $0x10] ss:$8 sps:$4 sm:$0xff]  }
  0x89   : > { %v1199_v37 = vld [vmem:[%s1623_s14 + $0x34] ss:$8 sps:$4 sm:$0xff]   ;;  %v1202_v39 = vld [vmem:[%s1623_s14 + $0x30] ss:$8 sps:$4 sm:$0xff]   ;;  %v346_v41 = vshrl.u32 %v345_v40, 7  ;;  %v751_v48 = vld [vmem:[%s1636_s25] sm:$0xff] }
  0x8a   : > { %634 = vmatpush1.bf16.msra.mxu0 %v1154_v7  ;;  %1046 = vmatpush1.bf16.msra.mxu1 %v1154_v7  ;;  %v343_v43 = vld [vmem:[%s1767_s2] sm:$0x3]  ;;  %v752_v54 = vld [vmem:[%s1636_s25 + $0x8] sm:$0xff]  ;;  %v753_v60 = vld [vmem:[%s1636_s25 + $0x10] sm:$0xff]  ;;  %s1026_s28 = sshll.u32 %s1373_s18, 11  ;;  %s816_s10 = sshll.u32 %s1675_s26, 4  ;;  %s1710_s10 = int_to_ptr.vmem [resolvable:$true] %s816_s10 }
  0x8b   : > { %635 = vmatprep.subr.bf16.mxu0 %v1155_v8  ;;  %1031 = vmatprep.subr.bf16.mxu1 %v1155_v8  ;;  %v347_v42 = vsub.s32 0, %v346_v41  ;;  %v351_v44 = vsub.s32 1, %v346_v41  ;;  %v759_v50 = vld [vmem:[%s1636_s25 + $0x40] sm:$0xff]  ;;  %v760_v56 = vld [vmem:[%s1636_s25 + $0x48] sm:$0xff]  ;;  %v761_v62 = vld [vmem:[%s1636_s25 + $0x50] sm:$0xff]  ;;  %s1708_s24 = scalar_lea.hbm %s1769_s4, %s1026_s28  ;;  %s800_s9 = scalar_lea.sflag [#allocation5], %s1620_s29 }
  0x8c   : > { %v754_v4 = vld [vmem:[%s1636_s25 + $0x18] sm:$0xff]  ;;  %s1291_s0 = scalar_lea.vmem %s1710_s10, 2048  ;;  %p1795_p13 = scmp.ne.s32.totalorder %s1784_s6, 0 }
  0x8d   : > { %v1653_v45 = vrot.slane %v343_v43, %v347_v42  ;;  %v1655_v46 = vrot.slane %v343_v43, %v351_v44  ;;  %v762_v6 = vld [vmem:[%s1636_s25 + $0x58] sm:$0xff]  ;;  %p1292_p8 = scmp.ne.s32.totalorder %s1710_s10, %s1291_s0  ;;  %s1390_s3 = smov [#allocation9]  }
  0x8e   : > { %636 = vmatpush1.bf16.msra.mxu0 %v1157_v9  ;;  %1047 = vmatpush1.bf16.msra.mxu1 %v1157_v9  ;;  %s1295_s21 = sshll.u32 %s1390_s3, 4  ;;  %s1296_s21 = int_to_ptr.vmem [resolvable:$false] %s1295_s21 }
  0x8f   : > { %637 = vmatprep.subr.bf16.mxu0 %v1158_v10  ;;  %1032 = vmatprep.subr.bf16.mxu1 %v1158_v10  ;;  %p1293_p3 = pnand %p1292_p8, %p1795_p13  ;;  %s1297_s11 = scalar_lea.vmem %s1296_s21, 4096 }
  0x90   : > { %p1298_p1 = scmp.lt.s32.totalorder %s1710_s10, %s1296_s21  ;;  %p1299_p4 = scmp.lt.s32.totalorder %s1297_s11, %s1291_s0 }
  0x91   : > { %p1294_p7 = pneg %p1293_p3 }
  0x92   : > { %638 = vmatpush1.bf16.msra.mxu0 %v1160_v11  ;;  %1048 = vmatpush1.bf16.msra.mxu1 %v1160_v11  ;;  %p1300_p2 = por %p1299_p4, %p1298_p1 }
  0x93   : > { %639 = vmatprep.subr.bf16.mxu0 %v1161_v12  ;;  %1033 = vmatprep.subr.bf16.mxu1 %v1161_v12 }
  0x94   : > { %p1301_p6 = pnand %p1300_p2, %p1294_p7 }
  0x96   : > { %640 = vmatpush1.bf16.msra.mxu0 %v1163_v14  ;;  %1049 = vmatpush1.bf16.msra.mxu1 %v1163_v14 }
  0x97   : > { %641 = vmatprep.subr.bf16.mxu0 %v1164_v16  ;;  %1034 = vmatprep.subr.bf16.mxu1 %v1164_v16  ;;  %v755_v16 = vld [vmem:[%s1636_s25 + $0x20] sm:$0xff] }
  0x9a   : > { %642 = vmatpush1.bf16.msra.mxu0 %v1166_v17  ;;  %1050 = vmatpush1.bf16.msra.mxu1 %v1166_v17 }
  0x9b   : > { %643 = vmatprep.subr.bf16.mxu0 %v1167_v18  ;;  %1035 = vmatprep.subr.bf16.mxu1 %v1167_v18  ;;  %v763_v18 = vld [vmem:[%s1636_s25 + $0x60] sm:$0xff] }
  0x9e   : > { %644 = vmatpush1.bf16.msra.mxu0 %v1169_v19  ;;  %1051 = vmatpush1.bf16.msra.mxu1 %v1169_v19 }
  0x9f   : > { %645 = vmatprep.subr.bf16.mxu0 %v1170_v20  ;;  %1036 = vmatprep.subr.bf16.mxu1 %v1170_v20 }
  0xa2   : > { %646 = vmatpush1.bf16.msra.mxu0 %v1172_v21  ;;  %1052 = vmatpush1.bf16.msra.mxu1 %v1172_v21 }
  0xa3   : > { %647 = vmatprep.subr.bf16.mxu0 %v1173_v22  ;;  %1037 = vmatprep.subr.bf16.mxu1 %v1173_v22  ;;  %v756_v22 = vld [vmem:[%s1636_s25 + $0x28] sm:$0xff] }
  0xa6   : > { %648 = vmatpush1.bf16.msra.mxu0 %v1175_v23  ;;  %1053 = vmatpush1.bf16.msra.mxu1 %v1175_v23 }
  0xa7   : > { %649 = vmatprep.subr.bf16.mxu0 %v1176_v24  ;;  %1038 = vmatprep.subr.bf16.mxu1 %v1176_v24  ;;  %v764_v24 = vld [vmem:[%s1636_s25 + $0x68] sm:$0xff] }
  0xaa   : > { %650 = vmatpush1.bf16.msra.mxu0 %v1178_v25  ;;  %1054 = vmatpush1.bf16.msra.mxu1 %v1178_v25 }
  0xab   : > { %651 = vmatprep.subr.bf16.mxu0 %v1179_v26  ;;  %1039 = vmatprep.subr.bf16.mxu1 %v1179_v26 }
  0xae   : > { %652 = vmatpush1.bf16.msra.mxu0 %v1181_v27  ;;  %1055 = vmatpush1.bf16.msra.mxu1 %v1181_v27 }
  0xaf   : > { %653 = vmatprep.subr.bf16.mxu0 %v1182_v28  ;;  %1040 = vmatprep.subr.bf16.mxu1 %v1182_v28  ;;  %v757_v28 = vld [vmem:[%s1636_s25 + $0x30] sm:$0xff] }
  0xb2   : > { %654 = vmatpush1.bf16.msra.mxu0 %v1184_v29  ;;  %1056 = vmatpush1.bf16.msra.mxu1 %v1184_v29 }
  0xb3   : > { %655 = vmatprep.subr.bf16.mxu0 %v1185_v30  ;;  %1041 = vmatprep.subr.bf16.mxu1 %v1185_v30  ;;  %v765_v30 = vld [vmem:[%s1636_s25 + $0x70] sm:$0xff] }
  0xb6   : > { %656 = vmatpush1.bf16.msra.mxu0 %v1187_v31  ;;  %1057 = vmatpush1.bf16.msra.mxu1 %v1187_v31 }
  0xb7   : > { %657 = vmatprep.subr.bf16.mxu0 %v1188_v32  ;;  %1042 = vmatprep.subr.bf16.mxu1 %v1188_v32 }
  0xba   : > { %658 = vmatpush1.bf16.msra.mxu0 %v1190_v33  ;;  %1058 = vmatpush1.bf16.msra.mxu1 %v1190_v33 }
  0xbd   : > { %660 = vmatmul.mubr.bf16.vlgmr.msra.gmra.mrb[0].mxu0 %v1191_v34  ;;  %680 = vmatmul.mubr.bf16.vlgmr.msra.gmra.mrb[0].mxu1 %v1194_v35 }
  0xbe   : > { %669 = vmatprep.mubr.bf16.mxu0 %v1197_v36  ;;  %689 = vmatprep.mubr.bf16.mxu1 %v1199_v37  ;;  %v758_v36 = vld [vmem:[%s1636_s25 + $0x38] sm:$0xff] }
  0xc5   : > { %670 = vmatmul.mubr.bf16.gmra.mrb[4].mxu0 %v1201_v38  ;;  %690 = vmatmul.mubr.bf16.gmra.mrb[4].mxu1 %v1202_v39  ;;  %v766_v38 = vld [vmem:[%s1636_s25 + $0x78] sm:$0xff] }
 0x190   : > { %v661_v47 = vpop.f32.mrb[0].mxu0  ;;  %v681_v49 = vpop.f32.mrb[0].mxu1 }
 0x191   : > { %v700_v51 = vadd.f32 %v661_v47, %v1653_v45  ;;  %v708_v52 = vadd.f32 %v681_v49, %v1653_v45  ;;  %v663_v53 = vpop.f32.mrb[1].mxu0  ;;  %v683_v55 = vpop.f32.mrb[1].mxu1 }
 0x192   : > { %v701_v57 = vadd.f32 %v663_v53, %v1655_v46  ;;  %v709_v58 = vadd.f32 %v683_v55, %v1655_v46  ;;  %v665_v59 = vpop.f32.mrb[2].mxu0  ;;  %v685_v61 = vpop.f32.mrb[2].mxu1 }
 0x193   : > { %v767_v63 = vadd.f32 %v751_v48, %v700_v51  ;;  %v775_v0 = vadd.f32 %v759_v50, %v708_v52  ;;  %v702_v1 = vadd.f32 %v665_v59, %v1653_v45  ;;  %v710_v2 = vadd.f32 %v685_v61, %v1653_v45  ;;  %v667_v3 = vpop.f32.mrb[3].mxu0  ;;  %v687_v5 = vpop.f32.mrb[3].mxu1 }
 0x194   : > { %v768_v7 = vadd.f32 %v752_v54, %v701_v57  ;;  %v776_v8 = vadd.f32 %v760_v56, %v709_v58  ;;  %v703_v9 = vadd.f32 %v667_v3, %v1655_v46  ;;  %v711_v10 = vadd.f32 %v687_v5, %v1655_v46 }
 0x195   : > { %783 = vst [vmem:[%s1675_s26] sm:$0xff] %v767_v63  ;;  %791 = vst [vmem:[%s1675_s26 + $0x40] sm:$0xff] %v775_v0  ;;  %v769_v11 = vadd.f32 %v753_v60, %v702_v1  ;;  %v777_v12 = vadd.f32 %v761_v62, %v710_v2 }
 0x196   : > { %784 = vst [vmem:[%s1675_s26 + $0x8] sm:$0xff] %v768_v7  ;;  %792 = vst [vmem:[%s1675_s26 + $0x48] sm:$0xff] %v776_v8  ;;  %v770_v13 = vadd.f32 %v754_v4, %v703_v9  ;;  %v778_v14 = vadd.f32 %v762_v6, %v711_v10 }
 0x197   : > { %785 = vst [vmem:[%s1675_s26 + $0x10] sm:$0xff] %v769_v11  ;;  %793 = vst [vmem:[%s1675_s26 + $0x50] sm:$0xff] %v777_v12 }
 0x198   : > { %786 = vst [vmem:[%s1675_s26 + $0x18] sm:$0xff] %v770_v13  ;;  %794 = vst [vmem:[%s1675_s26 + $0x58] sm:$0xff] %v778_v14  ;;  %v671_v15 = vpop.f32.mrb[4].mxu0  ;;  %v691_v17 = vpop.f32.mrb[4].mxu1 }
 0x199   : > { %v704_v19 = vadd.f32 %v671_v15, %v1653_v45  ;;  %v712_v20 = vadd.f32 %v691_v17, %v1653_v45  ;;  %v673_v21 = vpop.f32.mrb[5].mxu0  ;;  %v693_v23 = vpop.f32.mrb[5].mxu1 }
 0x19a   : > { %v705_v25 = vadd.f32 %v673_v21, %v1655_v46  ;;  %v713_v26 = vadd.f32 %v693_v23, %v1655_v46  ;;  %v675_v27 = vpop.f32.mrb[6].mxu0  ;;  %v695_v29 = vpop.f32.mrb[6].mxu1 }
 0x19b   : > { %v771_v31 = vadd.f32 %v755_v16, %v704_v19  ;;  %v779_v32 = vadd.f32 %v763_v18, %v712_v20  ;;  %v706_v33 = vadd.f32 %v675_v27, %v1653_v45  ;;  %v714_v34 = vadd.f32 %v695_v29, %v1653_v45  ;;  %v677_v35 = vpop.f32.mrb[7].mxu0  ;;  %v697_v37 = vpop.f32.mrb[7].mxu1 }
 0x19c   : > { %v772_v39 = vadd.f32 %v756_v22, %v705_v25  ;;  %v780_v40 = vadd.f32 %v764_v24, %v713_v26  ;;  %v707_v41 = vadd.f32 %v677_v35, %v1655_v46  ;;  %v715_v42 = vadd.f32 %v697_v37, %v1655_v46 }
 0x19d   : > { %787 = vst [vmem:[%s1675_s26 + $0x20] sm:$0xff] %v771_v31  ;;  %795 = vst [vmem:[%s1675_s26 + $0x60] sm:$0xff] %v779_v32  ;;  %v773_v43 = vadd.f32 %v757_v28, %v706_v33  ;;  %v781_v44 = vadd.f32 %v765_v30, %v714_v34 }
 0x19e   : > { %788 = vst [vmem:[%s1675_s26 + $0x28] sm:$0xff] %v772_v39  ;;  %796 = vst [vmem:[%s1675_s26 + $0x68] sm:$0xff] %v780_v40  ;;  %v774_v45 = vadd.f32 %v758_v36, %v707_v41  ;;  %v782_v47 = vadd.f32 %v766_v38, %v715_v42 }
 0x19f   : > { %789 = vst [vmem:[%s1675_s26 + $0x30] sm:$0xff] %v773_v43  ;;  %797 = vst [vmem:[%s1675_s26 + $0x70] sm:$0xff] %v781_v44 }
 0x1a0   : > { %790 = vst [vmem:[%s1675_s26 + $0x38] sm:$0xff] %v774_v45  ;;  %798 = vst [vmem:[%s1675_s26 + $0x78] sm:$0xff] %v782_v47 }
 0x1a1   : > { %1304 = shalt.err (!%p1301_p6)
}
 0x1a2   : > { %s1305_s12 = scalar_lea.hbm %s1708_s24, 2048  ;;  %s1309_s14 = scalar_lea.hbm %s1769_s4, 4096 }
 0x1a3   : > { %p1306_p12 = scmp.ne.s32.totalorder %s1708_s24, %s1305_s12  ;;  %p1310_p11 = scmp.lt.u32.totalorder %s1708_s24, %s1769_s4 }
 0x1a4   : > { %p1311_p0 = scmp.lt.u32.totalorder %s1309_s14, %s1305_s12  ;;  %p1313_p8 = scmp.lt.u32.totalorder %s1305_s12, %s1708_s24 }
 0x1a5   : > { %p1307_p10 = pnand %p1306_p12, %p1795_p13 }
 0x1a6   : > { %p1312_p5 = por %p1311_p0, %p1310_p11 }
 0x1a7   : > { %p1308_p9 = pneg %p1307_p10 }
 0x1a8   : > { %p1314_p3 = por %p1313_p8, %p1312_p5 }
 0x1aa   : > { %p1315_p7 = pnand %p1314_p3, %p1308_p9 }
 0x1ac   : > { %1318 = shalt.err (!%p1315_p7)
}
 0x1ad   : > { %s1391_s13 = smov 256   ;;  %s1392_s22 = smov 16  }
 0x1ae   : > { %1067 = dma.vmem_to_hbm [thread:$0]  (%p1795_p13), %s1710_s10, 2048, %s1708_s24, %s800_s9, %s1391_s13, %s1391_s13, %s1392_s22  }
 0x1af PF: > { %s831_s26 = sand.u32 1, %s1361_s15   ;;  %p1796_p1 = scmp.ne.s32.totalorder %s1785_s8, 0 }
 0x1b0   : > { %p1797_p4 = scmp.ge.s32.totalorder %s1381_s20, 2  ;;  %s832_s28 = scalar_lea.sflag [#allocation5], %s831_s26 }
 0x1b2   : > { %p1081_p2 = pnand %p1797_p4, %p1796_p1 }
 0x1b4   : > { %1356 = dma.done.wait (!%p1081_p2), %s832_s28, 2048  }
 0x1b5   : > { %1358 = vsyncadd (!%p1081_p2), %s832_s28, 4294965248  ;;  %s21_s20 = sadd.s32 1, %s1381_s20   ;;  %s1798_s6 = sld [smem:[#allocation14_spill]] }
 0x1b6   : > { %p18_p6 = scmp.ge.s32.totalorder %s21_s20, 4   ;;  %s1799_s15 = smov %s1365_s16 }
 0x1b7   : > { %s1800_s16 = smov %s1369_s17  ;;  %s1801_s17 = smov %s1469_s27 }
 0x1b8   : > { %s1802_s18 = smov %s1377_s19  ;;  %20 = sbr.rel (!%p18_p6) target bundleno = 10 (0xa), region = 108 }
 0x1bb   : > { %s1803_s19 = smov %s1798_s6 }
 0x1bf   :  { %837 = vsyncpa [#allocation4], 1 }
 0x1c0   :  { %839 = vsyncpa [#allocation4 + $0x1], 1 }
 0x1c1   :  { %840 = vsyncpa [#allocation7], 1 }
 0x1c2   :  { %841 = vsyncpa [#allocation5], 1 }
 0x1c3   :  { %843 = vsyncpa [#allocation5 + $0x1], 1 }

</bundles_post_ra>
